<compile_context>
chip_gen: v7x
topology: tpu7x:2x2x1
jax: 0.10.0
libtpu: 0.0.40
codegen_flags: <defaults>
</compile_context>

<pallas_src>
import functools

import jax
import jax.numpy as jnp
from jax.experimental import pallas as pl
from jax.experimental.pallas import tpu as pltpu

BN_EPS = 1e-5
LEAKY_SLOPE = 0.01          # nn.LeakyReLU() default

_VMEM_BUDGET = 36 * 1024 * 1024   # working-set budget used for tile selection
_VMEM_LIMIT = 48 * 1024 * 1024    # scoped VMEM limit handed to Mosaic (< v7x 64 MiB)
_TN = 128                         # channel tile (lane-dense)


def _round_up(x, m):
    return (x + m - 1) // m * m


def _tile_footprint_bytes(tm, k_p, tn):
    # double-buffered bf16 patch + weight tiles, f32 conv-out tile, stat rows
    return (2 * tm * k_p * 2      # patches (bf16), 2 buffers
            + 2 * k_p * tn * 2    # weights (bf16), 2 buffers
            + 2 * tm * tn * 4     # conv output tile (f32), 2 buffers
            + 4 * tn * 4)         # sum / sumsq rows


def _pick_tm(m, k_p, tn):
    """Largest M tile (multiple of 16, <=512) that fits the VMEM budget."""
    m16 = _round_up(m, 16)
    if m16 <= 512 and _tile_footprint_bytes(m16, k_p, tn) <= _VMEM_BUDGET:
        return m16                      # whole (rounded) M in one tile
    for tm in (512, 256, 128, 64, 32, 16):
        if _tile_footprint_bytes(tm, k_p, tn) <= _VMEM_BUDGET:
            return min(tm, m16)
    return 16


# ---------------------------------------------------------------------------
# Pass 1: im2col matmul (bf16 in, f32 acc) + per-channel sum / sum-of-squares.
# Grid = (C_out tiles [parallel], M tiles [arbitrary]).
# The stat outputs map to the same block for every M tile -> resident
# accumulators, initialized at the first M tile.
# ---------------------------------------------------------------------------
def _conv_stats_kernel(p_ref, w_ref, y_ref, sum_ref, ssq_ref):
    @pl.when(pl.program_id(1) == 0)
    def _():
        sum_ref[...] = jnp.zeros_like(sum_ref)
        ssq_ref[...] = jnp.zeros_like(ssq_ref)

    y = jnp.dot(p_ref[...], w_ref[...], preferred_element_type=jnp.float32)
    y_ref[...] = y
    sum_ref[...] += jnp.sum(y, axis=0, keepdims=True)
    ssq_ref[...] += jnp.sum(y * y, axis=0, keepdims=True)


# ---------------------------------------------------------------------------
# Pass 2: BN normalize (f32, gamma folded into the scale) + LeakyReLU.
# Writes in place over the conv output via input_output_aliases.
# ---------------------------------------------------------------------------
def _bn_lrelu_kernel(y_ref, sum_ref, ssq_ref, g_ref, b_ref, o_ref, *, inv_m):
    mean = sum_ref[...] * inv_m
    var = jnp.maximum(ssq_ref[...] * inv_m - mean * mean, 0.0)
    scale = g_ref[...] * jax.lax.rsqrt(var + BN_EPS)     # (1, tn)
    shift = b_ref[...] - mean * scale                    # (1, tn)
    z = y_ref[...] * scale + shift                       # single FMA pass
    o_ref[...] = jnp.where(z >= 0, z, LEAKY_SLOPE * z)


def _extract_patches(x_nhwc):
    """(N, H, W, C) -> (N*Ho*Wo, C*16) patches for k=4, s=2, p=1.

    K flattens as (C, kh, kw), matching PyTorch Conv2d weight layout
    (C_out, C_in, kh, kw).reshape(C_out, -1). Built directly in the target
    order (no stack + transpose copy).
    """
    n, h, w, c = x_nhwc.shape
    ho, wo = h // 2, w // 2
    xp = jnp.pad(x_nhwc, ((0, 0), (1, 1), (1, 1), (0, 0)))
    taps = []
    for kh in range(4):
        for kw in range(4):
            taps.append(xp[:, kh:kh + 2 * ho:2, kw:kw + 2 * wo:2, :])
    patches = jnp.stack(taps, axis=-1)          # (N, Ho, Wo, C, 16)
    return patches.reshape(n * ho * wo, c * 16), (n, ho, wo)


def _encoder_block_nhwc(x_nhwc, conv_w, conv_b, bn_gamma, bn_beta):
    del conv_b  # per-channel constant; cancels exactly through BN mean subtraction
    n, h, w, c_in = x_nhwc.shape
    c_out = conv_w.shape[0]
    ho, wo = h // 2, w // 2
    m = n * ho * wo
    k = c_in * 16

    k_p = _round_up(k, 128)
    c_out_p = _round_up(c_out, _TN)
    tn = _TN
    tm = _pick_tm(m, k_p, tn)
    m_p = _round_up(m, tm)

    patches, _ = _extract_patches(x_nhwc)
    patches = jnp.pad(patches.astype(jnp.bfloat16),
                      ((0, m_p - m), (0, k_p - k)))
    w_mat = conv_w.reshape(c_out, k).T.astype(jnp.bfloat16)      # (K, C_out)
    w_mat = jnp.pad(w_mat, ((0, k_p - k), (0, c_out_p - c_out)))
    g_row = jnp.pad(bn_gamma.astype(jnp.float32).reshape(1, c_out),
                    ((0, 0), (0, c_out_p - c_out)))
    b_row = jnp.pad(bn_beta.astype(jnp.float32).reshape(1, c_out),
                    ((0, 0), (0, c_out_p - c_out)))

    grid = (c_out_p // tn, m_p // tm)

    # Pass 1: conv (matmul) + per-channel batch statistics.
    y, s_sum, s_sq = pl.pallas_call(
        _conv_stats_kernel,
        out_shape=(jax.ShapeDtypeStruct((m_p, c_out_p), jnp.float32),
                   jax.ShapeDtypeStruct((1, c_out_p), jnp.float32),
                   jax.ShapeDtypeStruct((1, c_out_p), jnp.float32)),
        grid=grid,
        in_specs=[
            pl.BlockSpec((tm, k_p), lambda co, mi: (mi, 0)),
            pl.BlockSpec((k_p, tn), lambda co, mi: (0, co)),
        ],
        out_specs=(
            pl.BlockSpec((tm, tn), lambda co, mi: (mi, co)),
            pl.BlockSpec((1, tn), lambda co, mi: (0, co)),
            pl.BlockSpec((1, tn), lambda co, mi: (0, co)),
        ),
        compiler_params=pltpu.CompilerParams(
            dimension_semantics=("parallel", "arbitrary"),
            vmem_limit_bytes=_VMEM_LIMIT),
    )(patches, w_mat)

    # Pass 2: BN normalize + LeakyReLU, in place over the conv output.
    out = pl.pallas_call(
        functools.partial(_bn_lrelu_kernel, inv_m=1.0 / float(m)),
        out_shape=jax.ShapeDtypeStruct((m_p, c_out_p), jnp.float32),
        grid=grid,
        in_specs=[
            pl.BlockSpec((tm, tn), lambda co, mi: (mi, co)),
            pl.BlockSpec((1, tn), lambda co, mi: (0, co)),
            pl.BlockSpec((1, tn), lambda co, mi: (0, co)),
            pl.BlockSpec((1, tn), lambda co, mi: (0, co)),
            pl.BlockSpec((1, tn), lambda co, mi: (0, co)),
        ],
        out_specs=pl.BlockSpec((tm, tn), lambda co, mi: (mi, co)),
        input_output_aliases={0: 0},
        compiler_params=pltpu.CompilerParams(
            dimension_semantics=("parallel", "parallel"),
            vmem_limit_bytes=_VMEM_LIMIT),
    )(y, s_sum, s_sq, g_row, b_row)

    out = out[:m, :c_out].reshape(n, ho, wo, c_out)
    return out


# NHWC entry point (preferred when chaining blocks: no layout ping-pong).
encoder_block_nhwc = jax.jit(_encoder_block_nhwc)


@jax.jit
def encoder_block(x_nchw, conv_w, conv_b, bn_gamma, bn_beta):
    """PyTorch-compatible NCHW wrapper.

    x_nchw : (N, C_in, H, W) f32
    conv_w : (C_out, C_in, 4, 4) f32,  conv_b : (C_out,) f32 (unused: cancels in BN)
    bn_gamma, bn_beta : (C_out,) f32
    returns (N, C_out, H//2, W//2) f32
    """
    x_nhwc = jnp.transpose(x_nchw, (0, 2, 3, 1))
    out = _encoder_block_nhwc(x_nhwc, conv_w, conv_b, bn_gamma, bn_beta)
    return jnp.transpose(out, (0, 3, 1, 2))


def _init_params(key, in_channels, out_channels):
    """Deterministic parameter init mirroring PyTorch defaults (shapes only)."""
    kw, kb = jax.random.split(key)
    fan_in = in_channels * 4 * 4
    bound = 1.0 / jnp.sqrt(fan_in)
    conv_w = jax.random.uniform(
        kw, (out_channels, in_channels, 4, 4), jnp.float32, -bound, bound)
    conv_b = jax.random.uniform(
        kb, (out_channels,), jnp.float32, -bound, bound)
    bn_gamma = jnp.ones((out_channels,), jnp.float32)
    bn_beta = jnp.zeros((out_channels,), jnp.float32)
    return conv_w, conv_b, bn_gamma, bn_beta


def _reference(x, w, b, g, be):
    y = jax.lax.conv_general_dilated(
        x, w, window_strides=(2, 2), padding=((1, 1), (1, 1)),
        dimension_numbers=("NCHW", "OIHW", "NCHW"))
    y = y + b.reshape(1, -1, 1, 1)
    mean = jnp.mean(y, axis=(0, 2, 3), keepdims=True)
    var = jnp.mean((y - mean) ** 2, axis=(0, 2, 3), keepdims=True)
    z = (y - mean) * jax.lax.rsqrt(var + BN_EPS)
    z = z * g.reshape(1, -1, 1, 1) + be.reshape(1, -1, 1, 1)
    return jnp.where(z >= 0, z, LEAKY_SLOPE * z)


if __name__ == "__main__":
    key = jax.random.PRNGKey(0)
    kx, kp = jax.random.split(key)

    N, C_IN, C_OUT, H, W = 2, 4, 8, 16, 16
    x = jax.random.normal(kx, (N, C_IN, H, W), jnp.float32)
    conv_w, conv_b, bn_gamma, bn_beta = _init_params(kp, C_IN, C_OUT)

    y = encoder_block(x, conv_w, conv_b, bn_gamma, bn_beta)
    y = jax.block_until_ready(y)

    assert y.shape == (N, C_OUT, H // 2, W // 2), y.shape
    assert y.dtype == jnp.float32

    # Numerical check vs. pure-JAX reference (bf16 MXU inputs -> loose tol).
    y_ref = jax.block_until_ready(_reference(x, conv_w, conv_b, bn_gamma, bn_beta))
    max_err = float(jnp.max(jnp.abs(y - y_ref)))
    assert max_err < 7.5e-2, max_err

    print("KERNEL_OK")
</pallas_src>

<mosaic_0001>
module attributes {stable_mosaic.version = 11 : i64} {
  func.func @_bn_lrelu_kernel(%arg0: i32, %arg1: i32, %arg2: memref<128x128xf32, #tpu.memory_space<vmem>>, %arg3: memref<1x128xf32, #tpu.memory_space<vmem>>, %arg4: memref<1x128xf32, #tpu.memory_space<vmem>>, %arg5: memref<1x128xf32, #tpu.memory_space<vmem>>, %arg6: memref<1x128xf32, #tpu.memory_space<vmem>>, %arg7: memref<128x128xf32, #tpu.memory_space<vmem>>) attributes {dimension_semantics = [#tpu.dimension_semantics<parallel>, #tpu.dimension_semantics<parallel>], iteration_bounds = array<i64: 1, 1>, scalar_prefetch = 0 : i64, scratch_operands = 0 : i64, tpu.core_type = #tpu.core_type<tc>, window_params = [{transform_indices = @transform_0, window_bounds = array<i64: 128, 128>}, {transform_indices = @transform_1, window_bounds = array<i64: 1, 128>}, {transform_indices = @transform_2, window_bounds = array<i64: 1, 128>}, {transform_indices = @transform_3, window_bounds = array<i64: 1, 128>}, {transform_indices = @transform_4, window_bounds = array<i64: 1, 128>}, {transform_indices = @transform_5, window_bounds = array<i64: 128, 128>}]} {
    %c0 = arith.constant 0 : index
    %c0_0 = arith.constant 0 : index
    %0 = vector.load %arg3[%c0, %c0_0] : memref<1x128xf32, #tpu.memory_space<vmem>>, vector<1x128xf32>
    %cst = arith.constant 7.812500e-03 : f32
    %1 = vector.broadcast %cst : f32 to vector<1x128xf32>
    %2 = arith.mulf %0, %1 : vector<1x128xf32>
    %c0_1 = arith.constant 0 : index
    %c0_2 = arith.constant 0 : index
    %3 = vector.load %arg4[%c0_1, %c0_2] : memref<1x128xf32, #tpu.memory_space<vmem>>, vector<1x128xf32>
    %cst_3 = arith.constant 7.812500e-03 : f32
    %4 = vector.broadcast %cst_3 : f32 to vector<1x128xf32>
    %5 = arith.mulf %3, %4 : vector<1x128xf32>
    %6 = arith.mulf %2, %2 : vector<1x128xf32>
    %7 = arith.subf %5, %6 : vector<1x128xf32>
    %cst_4 = arith.constant 0.000000e+00 : f32
    %8 = vector.broadcast %cst_4 : f32 to vector<1x128xf32>
    %9 = arith.maximumf %7, %8 : vector<1x128xf32>
    %c0_5 = arith.constant 0 : index
    %c0_6 = arith.constant 0 : index
    %10 = vector.load %arg5[%c0_5, %c0_6] : memref<1x128xf32, #tpu.memory_space<vmem>>, vector<1x128xf32>
    %cst_7 = arith.constant 9.99999974E-6 : f32
    %11 = vector.broadcast %cst_7 : f32 to vector<1x128xf32>
    %12 = arith.addf %9, %11 : vector<1x128xf32>
    %13 = math.rsqrt %12 : vector<1x128xf32>
    %14 = arith.mulf %10, %13 : vector<1x128xf32>
    %c0_8 = arith.constant 0 : index
    %c0_9 = arith.constant 0 : index
    %15 = vector.load %arg6[%c0_8, %c0_9] : memref<1x128xf32, #tpu.memory_space<vmem>>, vector<1x128xf32>
    %16 = arith.mulf %2, %14 : vector<1x128xf32>
    %17 = arith.subf %15, %16 : vector<1x128xf32>
    %c0_10 = arith.constant 0 : index
    %c0_11 = arith.constant 0 : index
    %18 = vector.load %arg2[%c0_10, %c0_11] : memref<128x128xf32, #tpu.memory_space<vmem>>, vector<128x128xf32>
    %19 = vector.broadcast %14 : vector<1x128xf32> to vector<128x128xf32>
    %20 = arith.mulf %18, %19 : vector<128x128xf32>
    %21 = vector.broadcast %17 : vector<1x128xf32> to vector<128x128xf32>
    %22 = arith.addf %20, %21 : vector<128x128xf32>
    %cst_12 = arith.constant 0.000000e+00 : f32
    %23 = vector.broadcast %cst_12 : f32 to vector<128x128xf32>
    %24 = arith.cmpf oge, %22, %23 : vector<128x128xf32>
    %cst_13 = arith.constant 0.00999999977 : f32
    %25 = vector.broadcast %cst_13 : f32 to vector<128x128xf32>
    %26 = arith.mulf %25, %22 : vector<128x128xf32>
    %27 = arith.select %24, %22, %26 : vector<128x128xi1>, vector<128x128xf32>
    %c0_14 = arith.constant 0 : index
    %c0_15 = arith.constant 0 : index
    %28 = vector.load %arg7[%c0_14, %c0_15] : memref<128x128xf32, #tpu.memory_space<vmem>>, vector<128x128xf32>
    tpu.vector_store %arg7[%c0_14, %c0_15], %27 {strides = array<i32>} : memref<128x128xf32, #tpu.memory_space<vmem>>, vector<128x128xf32>,
    return
  }
  func.func @transform_0(%arg0: i32, %arg1: i32) -> (i32, i32) {
    %c0_i32 = arith.constant 0 : i32
    return %arg1, %arg0 : i32, i32
  }
  func.func @transform_1(%arg0: i32, %arg1: i32) -> (i32, i32) {
    %c0_i32 = arith.constant 0 : i32
    %c0_i32_0 = arith.constant 0 : i32
    return %c0_i32, %arg0 : i32, i32
  }
  func.func @transform_2(%arg0: i32, %arg1: i32) -> (i32, i32) {
    %c0_i32 = arith.constant 0 : i32
    %c0_i32_0 = arith.constant 0 : i32
    return %c0_i32, %arg0 : i32, i32
  }
  func.func @transform_3(%arg0: i32, %arg1: i32) -> (i32, i32) {
    %c0_i32 = arith.constant 0 : i32
    %c0_i32_0 = arith.constant 0 : i32
    return %c0_i32, %arg0 : i32, i32
  }
  func.func @transform_4(%arg0: i32, %arg1: i32) -> (i32, i32) {
    %c0_i32 = arith.constant 0 : i32
    %c0_i32_0 = arith.constant 0 : i32
    return %c0_i32, %arg0 : i32, i32
  }
  func.func @transform_5(%arg0: i32, %arg1: i32) -> (i32, i32) {
    %c0_i32 = arith.constant 0 : i32
    return %arg1, %arg0 : i32, i32
  }
}

module attributes {stable_mosaic.version = 11 : i64} {
  func.func @_conv_stats_kernel(%arg0: i32, %arg1: i32, %arg2: memref<128x128xbf16, #tpu.memory_space<vmem>>, %arg3: memref<128x128xbf16, #tpu.memory_space<vmem>>, %arg4: memref<128x128xf32, #tpu.memory_space<vmem>>, %arg5: memref<1x128xf32, #tpu.memory_space<vmem>>, %arg6: memref<1x128xf32, #tpu.memory_space<vmem>>) attributes {dimension_semantics = [#tpu.dimension_semantics<parallel>, #tpu.dimension_semantics<arbitrary>], iteration_bounds = array<i64: 1, 1>, scalar_prefetch = 0 : i64, scratch_operands = 0 : i64, tpu.core_type = #tpu.core_type<tc>, window_params = [{transform_indices = @transform_0, window_bounds = array<i64: 128, 128>}, {transform_indices = @transform_1, window_bounds = array<i64: 128, 128>}, {transform_indices = @transform_2, window_bounds = array<i64: 128, 128>}, {transform_indices = @transform_3, window_bounds = array<i64: 1, 128>}, {transform_indices = @transform_4, window_bounds = array<i64: 1, 128>}]} {
    %c0_i32 = arith.constant 0 : i32
    %0 = arith.cmpi eq, %arg1, %c0_i32 : i32
    %1 = arith.extui %0 : i1 to i32
    %c0_i32_0 = arith.constant 0 : i32
    %2 = arith.cmpi ne, %1, %c0_i32_0 : i32
    scf.if %2 {
      %cst_16 = arith.constant 0.000000e+00 : f32
      %18 = vector.broadcast %cst_16 : f32 to vector<1x128xf32>
      %c0_17 = arith.constant 0 : index
      %c0_18 = arith.constant 0 : index
      %19 = vector.load %arg5[%c0_17, %c0_18] : memref<1x128xf32, #tpu.memory_space<vmem>>, vector<1x128xf32>
      tpu.vector_store %arg5[%c0_17, %c0_18], %18 {strides = array<i32>} : memref<1x128xf32, #tpu.memory_space<vmem>>, vector<1x128xf32>,
      %cst_19 = arith.constant 0.000000e+00 : f32
      %20 = vector.broadcast %cst_19 : f32 to vector<1x128xf32>
      %c0_20 = arith.constant 0 : index
      %c0_21 = arith.constant 0 : index
      %21 = vector.load %arg6[%c0_20, %c0_21] : memref<1x128xf32, #tpu.memory_space<vmem>>, vector<1x128xf32>
      tpu.vector_store %arg6[%c0_20, %c0_21], %20 {strides = array<i32>} : memref<1x128xf32, #tpu.memory_space<vmem>>, vector<1x128xf32>,
    } else {
    }
    %c0 = arith.constant 0 : index
    %c0_1 = arith.constant 0 : index
    %3 = vector.load %arg2[%c0, %c0_1] : memref<128x128xbf16, #tpu.memory_space<vmem>>, vector<128x128xbf16>
    %c0_2 = arith.constant 0 : index
    %c0_3 = arith.constant 0 : index
    %4 = vector.load %arg3[%c0_2, %c0_3] : memref<128x128xbf16, #tpu.memory_space<vmem>>, vector<128x128xbf16>
    %cst = arith.constant dense<0.000000e+00> : vector<128x128xf32>
    %5 = tpu.matmul %3, %4, %cst {dimension_numbers = #tpu.dot_dimension_numbers<[1], [0], [0], [1], [0, 0, 1, 1], [], []>} : vector<128x128xbf16>, vector<128x128xbf16>, vector<128x128xf32> -> vector<128x128xf32>
    %c0_4 = arith.constant 0 : index
    %c0_5 = arith.constant 0 : index
    %6 = vector.load %arg4[%c0_4, %c0_5] : memref<128x128xf32, #tpu.memory_space<vmem>>, vector<128x128xf32>
    tpu.vector_store %arg4[%c0_4, %c0_5], %5 {strides = array<i32>} : memref<128x128xf32, #tpu.memory_space<vmem>>, vector<128x128xf32>,
    %c0_6 = arith.constant 0 : index
    %c0_7 = arith.constant 0 : index
    %7 = vector.load %arg5[%c0_6, %c0_7] : memref<1x128xf32, #tpu.memory_space<vmem>>, vector<1x128xf32>
    %cst_8 = arith.constant dense<0.000000e+00> : vector<128xf32>
    %8 = vector.multi_reduction <add>, %5, %cst_8 [0] : vector<128x128xf32> to vector<128xf32>
    %9 = vector.shape_cast %8 : vector<128xf32> to vector<1x128xf32>
    %10 = arith.addf %7, %9 : vector<1x128xf32>
    %c0_9 = arith.constant 0 : index
    %c0_10 = arith.constant 0 : index
    %11 = vector.load %arg5[%c0_9, %c0_10] : memref<1x128xf32, #tpu.memory_space<vmem>>, vector<1x128xf32>
    tpu.vector_store %arg5[%c0_9, %c0_10], %10 {strides = array<i32>} : memref<1x128xf32, #tpu.memory_space<vmem>>, vector<1x128xf32>,
    %c0_11 = arith.constant 0 : index
    %c0_12 = arith.constant 0 : index
    %12 = vector.load %arg6[%c0_11, %c0_12] : memref<1x128xf32, #tpu.memory_space<vmem>>, vector<1x128xf32>
    %13 = arith.mulf %5, %5 : vector<128x128xf32>
    %cst_13 = arith.constant dense<0.000000e+00> : vector<128xf32>
    %14 = vector.multi_reduction <add>, %13, %cst_13 [0] : vector<128x128xf32> to vector<128xf32>
    %15 = vector.shape_cast %14 : vector<128xf32> to vector<1x128xf32>
    %16 = arith.addf %12, %15 : vector<1x128xf32>
    %c0_14 = arith.constant 0 : index
    %c0_15 = arith.constant 0 : index
    %17 = vector.load %arg6[%c0_14, %c0_15] : memref<1x128xf32, #tpu.memory_space<vmem>>, vector<1x128xf32>
    tpu.vector_store %arg6[%c0_14, %c0_15], %16 {strides = array<i32>} : memref<1x128xf32, #tpu.memory_space<vmem>>, vector<1x128xf32>,
    return
  }
  func.func @transform_0(%arg0: i32, %arg1: i32) -> (i32, i32) {
    %c0_i32 = arith.constant 0 : i32
    %c0_i32_0 = arith.constant 0 : i32
    return %arg1, %c0_i32 : i32, i32
  }
  func.func @transform_1(%arg0: i32, %arg1: i32) -> (i32, i32) {
    %c0_i32 = arith.constant 0 : i32
    %c0_i32_0 = arith.constant 0 : i32
    return %c0_i32, %arg0 : i32, i32
  }
  func.func @transform_2(%arg0: i32, %arg1: i32) -> (i32, i32) {
    %c0_i32 = arith.constant 0 : i32
    return %arg1, %arg0 : i32, i32
  }
  func.func @transform_3(%arg0: i32, %arg1: i32) -> (i32, i32) {
    %c0_i32 = arith.constant 0 : i32
    %c0_i32_0 = arith.constant 0 : i32
    return %c0_i32, %arg0 : i32, i32
  }
  func.func @transform_4(%arg0: i32, %arg1: i32) -> (i32, i32) {
    %c0_i32 = arith.constant 0 : i32
    %c0_i32_0 = arith.constant 0 : i32
    return %c0_i32, %arg0 : i32, i32
  }
}

</mosaic_0001>

<bundles_post_ra>
// kernel: encoder_block.3
= control target key start
LH: loop header
LB: loop body
LE: loop exit
PB: predicated region body
PF: predicated region fallthrough
CT: control target
= control target key end

     0   :  { %v51_v8 = vlaneseq  ;;  %s341_s1 = inlined_call_operand.vmem [shape: f32[1,128], index: 1, kind: input, shape index: {}]   ;;  %s342_s2 = inlined_call_operand.vmem [shape: f32[1,128], index: 2, kind: input, shape index: {}]   ;;  %s343_s3 = inlined_call_operand.vmem [shape: f32[1,128], index: 3, kind: input, shape index: {}]   ;;  %s344_s0 = inlined_call_operand.vmem [shape: f32[128,128], index: 0, kind: input, shape index: {}, may-alias: {0,5}]   ;;  %s345_s4 = inlined_call_operand.vmem [shape: f32[1,128], index: 4, kind: input, shape index: {}]   ;;  %s346_s5 = inlined_call_operand.vmem [shape: f32[128,128], index: 5, kind: output, shape index: {}, may-alias: {0,5}]  }
   0x1   :  { %v20_v0 = vld [vmem:[%s341_s1] sm:$0x1]  ;;  %v35_v16 = vld [vmem:[%s344_s0 + $0x8] sm:$0xff]  ;;  %v36_v17 = vld [vmem:[%s344_s0 + $0x10] sm:$0xff] }
   0x2   :  { %v22_v1 = vld [vmem:[%s342_s2] sm:$0x1]  ;;  %v21_v2 = vmul.f32 0.0078125, %v20_v0  ;;  %v52_v9 = vshrl.u32 %v51_v8, 7  ;;  %v37_v18 = vld [vmem:[%s344_s0 + $0x18] sm:$0xff]  ;;  %v39_v22 = vld [vmem:[%s344_s0 + $0x28] sm:$0xff] }
   0x3   :  { %v23_v3 = vmul.f32 0.0078125, %v22_v1  ;;  %v27_v10 = vld [vmem:[%s343_s3] sm:$0x1]  ;;  %v40_v23 = vld [vmem:[%s344_s0 + $0x30] sm:$0xff]  ;;  %v41_v24 = vld [vmem:[%s344_s0 + $0x38] sm:$0xff] }
   0x4   :  { %v24_v4 = vmul.f32 %v21_v2, %v21_v2  ;;  %v53_v11 = vsub.s32 0, %v52_v9  ;;  %v31_v14 = vld [vmem:[%s345_s4] sm:$0x1]  ;;  %v43_v26 = vld [vmem:[%s344_s0 + $0x48] sm:$0xff]  ;;  %v44_v27 = vld [vmem:[%s344_s0 + $0x50] sm:$0xff] }
   0x5   :  { %v34_v15 = vld [vmem:[%s344_s0] sm:$0xff]  ;;  %v45_v32 = vld [vmem:[%s344_s0 + $0x58] sm:$0xff]  ;;  %v47_v34 = vld [vmem:[%s344_s0 + $0x68] sm:$0xff] }
   0x6   :  { %v25_v5 = vsub.f32 %v23_v3, %v24_v4  ;;  %v38_v19 = vld [vmem:[%s344_s0 + $0x20] sm:$0xff] }
   0x7   :  { %v42_v25 = vld [vmem:[%s344_s0 + $0x40] sm:$0xff] }
   0x8   :  { %v26_v6 = vmax.f32 %v25_v5, 0.0  ;;  %v46_v33 = vld [vmem:[%s344_s0 + $0x60] sm:$0xff] }
   0xa   :  { %v28_v7 = vadd.f32 1e-05, %v26_v6 }
   0xc   :  { %162 = vrsqrt.f32 %v28_v7 }
  0x16   :  { %v163_v12 = vpop.eup %162 }
  0x17   :  { %v30_v13 = vmul.f32 %v163_v12, %v27_v10 }
  0x19   :  { %v32_v20 = vmul.f32 %v30_v13, %v21_v2  ;;  %v221_v21 = vrot.slane %v30_v13, %v53_v11 }
  0x1b   :  { %v33_v28 = vsub.f32 %v31_v14, %v32_v20  ;;  %v56_v29 = vmul.f32 %v221_v21, %v34_v15  ;;  %v57_v30 = vmul.f32 %v221_v21, %v35_v16  ;;  %v58_v31 = vmul.f32 %v221_v21, %v36_v17 }
  0x1c   :  { %v59_v35 = vmul.f32 %v221_v21, %v37_v18  ;;  %v60_v36 = vmul.f32 %v221_v21, %v38_v19  ;;  %v61_v37 = vmul.f32 %v221_v21, %v39_v22  ;;  %v62_v38 = vmul.f32 %v221_v21, %v40_v23 }
  0x1d   :  { %v257_v39 = vrot.slane %v33_v28, %v53_v11  ;;  %v63_v40 = vmul.f32 %v221_v21, %v41_v24  ;;  %v64_v41 = vmul.f32 %v221_v21, %v42_v25  ;;  %v65_v42 = vmul.f32 %v221_v21, %v43_v26 }
  0x1e   :  { %v66_v43 = vmul.f32 %v221_v21, %v44_v27  ;;  %v67_v44 = vmul.f32 %v221_v21, %v45_v32  ;;  %v68_v45 = vmul.f32 %v221_v21, %v46_v33  ;;  %v266_v46 = vmul.f32 %v221_v21, %v47_v34 }
  0x1f   :  { %v78_v47 = vadd.f32 %v257_v39, %v56_v29  ;;  %v79_v48 = vadd.f32 %v257_v39, %v57_v30  ;;  %v80_v49 = vadd.f32 %v257_v39, %v58_v31  ;;  %v81_v50 = vadd.f32 %v257_v39, %v59_v35 }
  0x20   :  { %v82_v51 = vadd.f32 %v257_v39, %v60_v36  ;;  %v83_v52 = vadd.f32 %v257_v39, %v61_v37  ;;  %v84_v53 = vadd.f32 %v257_v39, %v62_v38  ;;  %v85_v54 = vadd.f32 %v257_v39, %v63_v40 }
  0x21   :  { %vm94_vm0 = vcmp.ge.f32.partialorder %v78_v47, 0.0  ;;  %v110_v55 = vmul.f32 0.01, %v78_v47  ;;  %vm95_vm1 = vcmp.ge.f32.partialorder %v79_v48, 0.0  ;;  %v111_v56 = vmul.f32 0.01, %v79_v48 }
  0x22   :  { %vm96_vm2 = vcmp.ge.f32.partialorder %v80_v49, 0.0  ;;  %v112_v57 = vmul.f32 0.01, %v80_v49  ;;  %vm97_vm3 = vcmp.ge.f32.partialorder %v81_v50, 0.0  ;;  %v113_v58 = vmul.f32 0.01, %v81_v50 }
  0x23   :  { %v126_v59 = vsel %vm94_vm0, %v78_v47, %v110_v55  ;;  %v127_v60 = vsel %vm95_vm1, %v79_v48, %v111_v56  ;;  %vm98_vm4 = vcmp.ge.f32.partialorder %v82_v51, 0.0  ;;  %v114_v61 = vmul.f32 0.01, %v82_v51 }
  0x24   :  { %142 = vst [vmem:[%s346_s5] sm:$0xff] %v126_v59  ;;  %143 = vst [vmem:[%s346_s5 + $0x8] sm:$0xff] %v127_v60  ;;  %v128_v62 = vsel %vm96_vm2, %v80_v49, %v112_v57  ;;  %v129_v63 = vsel %vm97_vm3, %v81_v50, %v113_v58  ;;  %vm99_vm5 = vcmp.ge.f32.partialorder %v83_v52, 0.0  ;;  %v115_v0 = vmul.f32 0.01, %v83_v52 }
  0x25   :  { %144 = vst [vmem:[%s346_s5 + $0x10] sm:$0xff] %v128_v62  ;;  %145 = vst [vmem:[%s346_s5 + $0x18] sm:$0xff] %v129_v63  ;;  %v130_v1 = vsel %vm98_vm4, %v82_v51, %v114_v61  ;;  %vm100_vm6 = vcmp.ge.f32.partialorder %v84_v53, 0.0  ;;  %v116_v2 = vmul.f32 0.01, %v84_v53  ;;  %vm101_vm7 = vcmp.ge.f32.partialorder %v85_v54, 0.0 }
  0x26   :  { %146 = vst [vmem:[%s346_s5 + $0x20] sm:$0xff] %v130_v1  ;;  %v131_v3 = vsel %vm99_vm5, %v83_v52, %v115_v0  ;;  %v117_v4 = vmul.f32 0.01, %v85_v54  ;;  %v86_v5 = vadd.f32 %v257_v39, %v64_v41  ;;  %v87_v6 = vadd.f32 %v257_v39, %v65_v42 }
  0x27   :  { %147 = vst [vmem:[%s346_s5 + $0x28] sm:$0xff] %v131_v3  ;;  %v132_v7 = vsel %vm100_vm6, %v84_v53, %v116_v2  ;;  %v88_v8 = vadd.f32 %v257_v39, %v66_v43  ;;  %v89_v9 = vadd.f32 %v257_v39, %v67_v44  ;;  %v90_v10 = vadd.f32 %v257_v39, %v68_v45 }
  0x28   :  { %148 = vst [vmem:[%s346_s5 + $0x30] sm:$0xff] %v132_v7  ;;  %v133_v11 = vsel %vm101_vm7, %v85_v54, %v117_v4  ;;  %vm102_vm8 = vcmp.ge.f32.partialorder %v86_v5, 0.0  ;;  %v118_v12 = vmul.f32 0.01, %v86_v5  ;;  %vm103_vm9 = vcmp.ge.f32.partialorder %v87_v6, 0.0 }
  0x29   :  { %v119_v15 = vmul.f32 0.01, %v87_v6  ;;  %vm104_vm10 = vcmp.ge.f32.partialorder %v88_v8, 0.0  ;;  %v120_v16 = vmul.f32 0.01, %v88_v8  ;;  %vm105_vm11 = vcmp.ge.f32.partialorder %v89_v9, 0.0 }
  0x2a   :  { %v134_v17 = vsel %vm102_vm8, %v86_v5, %v118_v12  ;;  %v121_v18 = vmul.f32 0.01, %v89_v9  ;;  %vm106_vm12 = vcmp.ge.f32.partialorder %v90_v10, 0.0  ;;  %v122_v19 = vmul.f32 0.01, %v90_v10 }
  0x2b   :  { %v135_v20 = vsel %vm103_vm9, %v87_v6, %v119_v15  ;;  %v136_v22 = vsel %vm104_vm10, %v88_v8, %v120_v16  ;;  %v91_v23 = vadd.f32 %v257_v39, %v266_v46 }
  0x2c   :  { %v137_v25 = vsel %vm105_vm11, %v89_v9, %v121_v18  ;;  %v138_v26 = vsel %vm106_vm12, %v90_v10, %v122_v19 }
  0x2d   :  { %vm107_vm13 = vcmp.ge.f32.partialorder %v91_v23, 0.0  ;;  %v123_v28 = vmul.f32 0.01, %v91_v23 }
  0x2f   :  { %v48_v13 = vld [vmem:[%s344_s0 + $0x70] sm:$0xff]  ;;  %v49_v14 = vld [vmem:[%s344_s0 + $0x78] sm:$0xff]  ;;  %v139_v31 = vsel %vm107_vm13, %v91_v23, %v123_v28 }
  0x30   :  { %149 = vst [vmem:[%s346_s5 + $0x38] sm:$0xff] %v133_v11  ;;  %150 = vst [vmem:[%s346_s5 + $0x40] sm:$0xff] %v134_v17  ;;  %v70_v24 = vmul.f32 %v221_v21, %v48_v13  ;;  %v71_v27 = vmul.f32 %v221_v21, %v49_v14 }
  0x31   :  { %151 = vst [vmem:[%s346_s5 + $0x48] sm:$0xff] %v135_v20  ;;  %152 = vst [vmem:[%s346_s5 + $0x50] sm:$0xff] %v136_v22 }
  0x32   :  { %153 = vst [vmem:[%s346_s5 + $0x58] sm:$0xff] %v137_v25  ;;  %154 = vst [vmem:[%s346_s5 + $0x60] sm:$0xff] %v138_v26  ;;  %v92_v29 = vadd.f32 %v257_v39, %v70_v24  ;;  %v93_v30 = vadd.f32 %v257_v39, %v71_v27 }
  0x33   :  { %155 = vst [vmem:[%s346_s5 + $0x68] sm:$0xff] %v139_v31 }
  0x34   :  { %vm108_vm14 = vcmp.ge.f32.partialorder %v92_v29, 0.0  ;;  %v124_v32 = vmul.f32 0.01, %v92_v29  ;;  %vm109_vm15 = vcmp.ge.f32.partialorder %v93_v30, 0.0  ;;  %v125_v21 = vmul.f32 0.01, %v93_v30 }
  0x36   :  { %v140_v33 = vsel %vm108_vm14, %v92_v29, %v124_v32  ;;  %v141_v34 = vsel %vm109_vm15, %v93_v30, %v125_v21 }
  0x37   :  { %156 = vst [vmem:[%s346_s5 + $0x70] sm:$0xff] %v140_v33  ;;  %157 = vst [vmem:[%s346_s5 + $0x78] sm:$0xff] %v141_v34 }

// kernel: encoder_block.2
= control target key start
LH: loop header
LB: loop body
LE: loop exit
PB: predicated region body
PF: predicated region fallthrough
CT: control target
= control target key end

     0   :  { %v435_v16 = vmov 0.0   ;;  %s575_s1 = inlined_call_operand.vmem [shape: bf16[128,128], index: 1, kind: input, shape index: {}]   ;;  %s576_s0 = inlined_call_operand.vmem [shape: bf16[128,128], index: 0, kind: input, shape index: {}]   ;;  %s577_s3 = inlined_call_operand.vmem [shape: f32[1,128], index: 3, kind: output, shape index: {1}]   ;;  %s578_s4 = inlined_call_operand.vmem [shape: f32[1,128], index: 4, kind: output, shape index: {2}]   ;;  %s579_s2 = inlined_call_operand.vmem [shape: f32[128,128], index: 2, kind: output, shape index: {0}]  }
   0x1   :  { %v419_v0 = vld [vmem:[%s575_s1] sm:$0xff]   ;;  %v420_v1 = vld [vmem:[%s575_s1 + $0x8] sm:$0xff]   ;;  %v421_v2 = vld [vmem:[%s575_s1 + $0x10] sm:$0xff]   ;;  %19 = vst [vmem:[%s577_s3] sm:$0x1] %v435_v16 }
   0x2   :  { %370 = vmatprep.subr.bf16.mxu0 %v419_v0  ;;  %402 = vmatprep.subr.bf16.mxu1 %v419_v0  ;;  %v422_v3 = vld [vmem:[%s575_s1 + $0x18] sm:$0xff]   ;;  %v427_v4 = vld [vmem:[%s576_s0] sm:$0xff]   ;;  %v424_v7 = vld [vmem:[%s575_s1 + $0x28] sm:$0xff]   ;;  %20 = vst [vmem:[%s578_s4] sm:$0x1] %v435_v16 }
   0x3   :  { %371 = vmatpush3.bf16.msra.mxu0 %v419_v0  ;;  %410 = vmatpush3.bf16.msra.mxu1 %v419_v0  ;;  %v423_v5 = vld [vmem:[%s575_s1 + $0x20] sm:$0xff]   ;;  %v425_v8 = vld [vmem:[%s575_s1 + $0x30] sm:$0xff]   ;;  %v426_v9 = vld [vmem:[%s575_s1 + $0x38] sm:$0xff]  }
   0x4   :  { %372 = vmatprep.subr.bf16.mxu0 %v420_v1  ;;  %403 = vmatprep.subr.bf16.mxu1 %v420_v1  ;;  %v431_v6 = vld [vmem:[%s576_s0 + $0x20] sm:$0xff]   ;;  %v428_v10 = vld [vmem:[%s576_s0 + $0x8] sm:$0xff]   ;;  %v429_v12 = vld [vmem:[%s576_s0 + $0x10] sm:$0xff]  }
   0x5   :  { %386 = vmatprep.mubr.bf16.mxu0 %v427_v4  ;;  %394 = vmatprep.mubr.bf16.mxu1 %v431_v6  ;;  %v432_v11 = vld [vmem:[%s576_s0 + $0x28] sm:$0xff]   ;;  %v433_v13 = vld [vmem:[%s576_s0 + $0x30] sm:$0xff]   ;;  %v430_v14 = vld [vmem:[%s576_s0 + $0x18] sm:$0xff]  }
   0x6   :  { %v434_v15 = vld [vmem:[%s576_s0 + $0x38] sm:$0xff]  }
   0x7   :  { %373 = vmatpush3.bf16.msra.mxu0 %v420_v1  ;;  %411 = vmatpush3.bf16.msra.mxu1 %v420_v1 }
   0x8   :  { %374 = vmatprep.subr.bf16.mxu0 %v421_v2  ;;  %404 = vmatprep.subr.bf16.mxu1 %v421_v2 }
   0xb   :  { %375 = vmatpush3.bf16.msra.mxu0 %v421_v2  ;;  %412 = vmatpush3.bf16.msra.mxu1 %v421_v2 }
   0xc   :  { %376 = vmatprep.subr.bf16.mxu0 %v422_v3  ;;  %405 = vmatprep.subr.bf16.mxu1 %v422_v3 }
   0xf   :  { %377 = vmatpush3.bf16.msra.mxu0 %v422_v3  ;;  %413 = vmatpush3.bf16.msra.mxu1 %v422_v3 }
  0x10   :  { %378 = vmatprep.subr.bf16.mxu0 %v423_v5  ;;  %406 = vmatprep.subr.bf16.mxu1 %v423_v5 }
  0x13   :  { %379 = vmatpush3.bf16.msra.mxu0 %v423_v5  ;;  %414 = vmatpush3.bf16.msra.mxu1 %v423_v5 }
  0x14   :  { %380 = vmatprep.subr.bf16.mxu0 %v424_v7  ;;  %407 = vmatprep.subr.bf16.mxu1 %v424_v7 }
  0x17   :  { %381 = vmatpush3.bf16.msra.mxu0 %v424_v7  ;;  %415 = vmatpush3.bf16.msra.mxu1 %v424_v7 }
  0x18   :  { %382 = vmatprep.subr.bf16.mxu0 %v425_v8  ;;  %408 = vmatprep.subr.bf16.mxu1 %v425_v8 }
  0x1b   :  { %383 = vmatpush3.bf16.msra.mxu0 %v425_v8  ;;  %416 = vmatpush3.bf16.msra.mxu1 %v425_v8 }
  0x1c   :  { %384 = vmatprep.subr.bf16.mxu0 %v426_v9  ;;  %409 = vmatprep.subr.bf16.mxu1 %v426_v9 }
  0x1f   :  { %385 = vmatpush3.bf16.msra.mxu0 %v426_v9  ;;  %417 = vmatpush3.bf16.msra.mxu1 %v426_v9 }
  0x22   :  { %387 = vmatmul.mubr.bf16.vlgmr.msra.gmra.mrb[0].mxu0 %v428_v10  ;;  %395 = vmatmul.mubr.bf16.vlgmr.msra.gmra.mrb[0].mxu1 %v432_v11 }
  0x23   :  { %390 = vmatprep.mubr.bf16.mxu0 %v429_v12  ;;  %398 = vmatprep.mubr.bf16.mxu1 %v433_v13 }
  0x2a   :  { %391 = vmatmul.mubr.bf16.gmra.mrb[4].mxu0 %v430_v14  ;;  %399 = vmatmul.mubr.bf16.gmra.mrb[4].mxu1 %v434_v15 }
  0xf5   :  { %v388_v17 = vpop.f32.mrb[0].mxu0  ;;  %v396_v18 = vpop.f32.mrb[0].mxu1 }
  0xf6   :  { %248 = vst [vmem:[%s579_s2 + $0x10] sm:$0xff] %v388_v17  ;;  %v183_v19 = vpop.f32.mrb[1].mxu0  ;;  %256 = vst [vmem:[%s579_s2 + $0x50] sm:$0xff] %v396_v18  ;;  %v215_v20 = vpop.f32.mrb[1].mxu1  ;;  %v289_v28 = vmul.f32 %v388_v17, %v388_v17  ;;  %v297_v60 = vmul.f32 %v396_v18, %v396_v18 }
  0xf7   :  { %246 = vst [vmem:[%s579_s2] sm:$0xff] %v183_v19  ;;  %v389_v21 = vpop.f32.mrb[2].mxu0  ;;  %254 = vst [vmem:[%s579_s2 + $0x40] sm:$0xff] %v215_v20  ;;  %v397_v22 = vpop.f32.mrb[2].mxu1  ;;  %v287_v25 = vmul.f32 %v183_v19, %v183_v19  ;;  %v295_v54 = vmul.f32 %v215_v20, %v215_v20 }
  0xf8   :  { %249 = vst [vmem:[%s579_s2 + $0x18] sm:$0xff] %v389_v21  ;;  %v186_v23 = vpop.f32.mrb[3].mxu0  ;;  %257 = vst [vmem:[%s579_s2 + $0x58] sm:$0xff] %v397_v22  ;;  %v218_v24 = vpop.f32.mrb[3].mxu1  ;;  %v290_v31 = vmul.f32 %v389_v21, %v389_v21  ;;  %v298_v63 = vmul.f32 %v397_v22, %v397_v22 }
  0xf9   :  { %247 = vst [vmem:[%s579_s2 + $0x8] sm:$0xff] %v186_v23  ;;  %v263_v26 = vadd.f32 %v186_v23, %v183_v19  ;;  %v288_v27 = vmul.f32 %v186_v23, %v186_v23  ;;  %255 = vst [vmem:[%s579_s2 + $0x48] sm:$0xff] %v218_v24  ;;  %v296_v59 = vmul.f32 %v218_v24, %v218_v24 }
  0xfb   :  { %v264_v29 = vadd.f32 %v388_v17, %v263_v26  ;;  %v303_v30 = vadd.f32 %v288_v27, %v287_v25  ;;  %v286_v27 = vld [vmem:[%s578_s4] sm:$0x1] }
  0xfd   :  { %v304_v32 = vadd.f32 %v303_v30, %v289_v28  ;;  %v392_v33 = vpop.f32.mrb[4].mxu0  ;;  %v265_v34 = vadd.f32 %v389_v21, %v264_v29  ;;  %v400_v35 = vpop.f32.mrb[4].mxu1 }
  0xfe   :  { %252 = vst [vmem:[%s579_s2 + $0x30] sm:$0xff] %v392_v33  ;;  %v199_v36 = vpop.f32.mrb[5].mxu0  ;;  %260 = vst [vmem:[%s579_s2 + $0x70] sm:$0xff] %v400_v35  ;;  %v231_v37 = vpop.f32.mrb[5].mxu1  ;;  %v293_v48 = vmul.f32 %v392_v33, %v392_v33  ;;  %v301_v8 = vmul.f32 %v400_v35, %v400_v35 }
  0xff   :  { %250 = vst [vmem:[%s579_s2 + $0x20] sm:$0xff] %v199_v36  ;;  %v266_v38 = vadd.f32 %v265_v34, %v199_v36  ;;  %v291_v39 = vmul.f32 %v199_v36, %v199_v36  ;;  %v305_v40 = vadd.f32 %v304_v32, %v290_v31  ;;  %v393_v41 = vpop.f32.mrb[6].mxu0  ;;  %258 = vst [vmem:[%s579_s2 + $0x60] sm:$0xff] %v231_v37  ;;  %v401_v42 = vpop.f32.mrb[6].mxu1 }
 0x100   :  { %253 = vst [vmem:[%s579_s2 + $0x38] sm:$0xff] %v393_v41  ;;  %v202_v43 = vpop.f32.mrb[7].mxu0  ;;  %261 = vst [vmem:[%s579_s2 + $0x78] sm:$0xff] %v401_v42  ;;  %v234_v44 = vpop.f32.mrb[7].mxu1  ;;  %v294_v51 = vmul.f32 %v393_v41, %v393_v41  ;;  %v299_v2 = vmul.f32 %v231_v37, %v231_v37  ;;  %v302_v11 = vmul.f32 %v401_v42, %v401_v42 }
 0x101   :  { %v306_v45 = vadd.f32 %v305_v40, %v291_v39  ;;  %251 = vst [vmem:[%s579_s2 + $0x28] sm:$0xff] %v202_v43  ;;  %v267_v46 = vadd.f32 %v266_v38, %v202_v43  ;;  %v292_v47 = vmul.f32 %v202_v43, %v202_v43  ;;  %259 = vst [vmem:[%s579_s2 + $0x68] sm:$0xff] %v234_v44 }
 0x102   :  { %v300_v7 = vmul.f32 %v234_v44, %v234_v44 }
 0x103   :  { %v268_v49 = vadd.f32 %v392_v33, %v267_v46  ;;  %v307_v50 = vadd.f32 %v306_v45, %v292_v47 }
 0x105   :  { %v308_v52 = vadd.f32 %v307_v50, %v293_v48  ;;  %v269_v53 = vadd.f32 %v393_v41, %v268_v49 }
 0x107   :  { %v270_v55 = vadd.f32 %v269_v53, %v215_v20  ;;  %v309_v56 = vadd.f32 %v308_v52, %v294_v51 }
 0x109   :  { %v310_v57 = vadd.f32 %v309_v56, %v295_v54  ;;  %v271_v58 = vadd.f32 %v270_v55, %v218_v24  ;;  %v262_v24 = vld [vmem:[%s577_s3] sm:$0x1] }
 0x10b   :  { %v272_v61 = vadd.f32 %v396_v18, %v271_v58  ;;  %v311_v62 = vadd.f32 %v310_v57, %v296_v59 }
 0x10d   :  { %v312_v0 = vadd.f32 %v311_v62, %v297_v60  ;;  %v273_v1 = vadd.f32 %v397_v22, %v272_v61 }
 0x10f   :  { %v274_v3 = vadd.f32 %v273_v1, %v231_v37  ;;  %v313_v4 = vadd.f32 %v312_v0, %v298_v63 }
 0x111   :  { %v314_v5 = vadd.f32 %v313_v4, %v299_v2  ;;  %v275_v6 = vadd.f32 %v274_v3, %v234_v44 }
 0x113   :  { %v276_v9 = vadd.f32 %v400_v35, %v275_v6  ;;  %v315_v10 = vadd.f32 %v314_v5, %v300_v7 }
 0x115   :  { %v277_v12 = vadd.f32 %v401_v42, %v276_v9  ;;  %v316_v13 = vadd.f32 %v315_v10, %v301_v8 }
 0x117   :  { %v278_v14 = vrot.slane %v277_v12, 4  ;;  %v317_v15 = vadd.f32 %v316_v13, %v302_v11 }
 0x119   :  { %v279_v16 = vadd.f32 %v278_v14, %v277_v12  ;;  %v318_v17 = vrot.slane %v317_v15, 4 }
 0x11b   :  { %v280_v18 = vrot.slane %v279_v16, 2  ;;  %v319_v19 = vadd.f32 %v318_v17, %v317_v15 }
 0x11d   :  { %v281_v20 = vadd.f32 %v280_v18, %v279_v16  ;;  %v320_v21 = vrot.slane %v319_v19, 2 }
 0x11f   :  { %v282_v22 = vrot.slane %v281_v20, 1  ;;  %v321_v23 = vadd.f32 %v320_v21, %v319_v19 }
 0x121   :  { %v283_v25 = vadd.f32 %v282_v22, %v281_v20  ;;  %v322_v26 = vrot.slane %v321_v23, 1 }
 0x123   :  { %v284_v28 = vadd.f32 %v283_v25, %v262_v24  ;;  %v323_v29 = vadd.f32 %v322_v26, %v321_v23 }
 0x125   :  { %285 = vst [vmem:[%s577_s3] sm:$0x1] %v284_v28  ;;  %v324_v30 = vadd.f32 %v323_v29, %v286_v27 }
 0x127   :  { %325 = vst [vmem:[%s578_s4] sm:$0x1] %v324_v30 }

</bundles_post_ra>
